<compile_context>
chip_gen: v7x
topology: tpu7x:2x2x1
jax: 0.10.0
libtpu: 0.0.40
codegen_flags: <defaults>
</compile_context>

<pallas_src>
import math

import jax
import jax.numpy as jnp
from jax.experimental import pallas as pl
from jax.experimental.pallas import tpu as pltpu


class ResultsObj:
    """JAX-side analogue of the PyTorch Results_Obj container."""

    def __init__(self):
        self.last_hidden_state = None

    def set_results(self, results):
        self.last_hidden_state = results


# ----------------------------------------------------------------------------
# Chunk planning (all static / trace-time).
# ----------------------------------------------------------------------------
_MIN_CHUNK_BYTES = 4 << 20   # >= 4 MiB per DMA chunk: below this, extra chunks
                             # are pure descriptor/semaphore overhead.
_MAX_CHUNKS = 4              # a handful of large DMAs already saturates HBM BW
                             # on v5e/v6e/v7x; more only adds issue latency.
_SMALL_BYPASS_BYTES = 1 << 20  # below ~1 MiB, Pallas launch overhead dominates.


def _chunk_plan(rows: int, cols: int, itemsize: int):
    """Static (start, size) row-chunks of a contiguous (rows, cols) array.

    Allows a ragged last chunk so odd row counts still get multi-engine
    concurrency; enforces a bytes-per-chunk floor and a chunk-count cap so
    small tensors get exactly one DMA."""
    total_bytes = rows * cols * itemsize
    n = max(1, min(_MAX_CHUNKS, total_bytes // _MIN_CHUNK_BYTES, rows))
    n = int(n)
    base, rem = divmod(rows, n)
    bounds = []
    start = 0
    for c in range(n):
        size = base + (1 if c < rem else 0)
        bounds.append((start, size))
        start += size
    return tuple(bounds)


def _make_hbm_copy_kernel(chunk_bounds):
    """Kernel that copies the whole input to the output purely with
    HBM -> HBM DMAs (no VMEM round-trip).  All chunk DMAs are started first
    (so multiple DMA engines run concurrently) and then waited on."""

    def kernel(x_hbm, o_hbm, sems):
        copies = []
        for c, (start, size) in enumerate(chunk_bounds):  # static, unrolled
            sl = pl.ds(start, size)
            copies.append(
                pltpu.make_async_copy(x_hbm.at[sl], o_hbm.at[sl], sems.at[c])
            )
        for cp in copies:
            cp.start()
        for cp in copies:
            cp.wait()

    return kernel


def pallas_identity_copy(x: jax.Array) -> jax.Array:
    """Bit-exact copy of `x` implemented as DMA-engine-only HBM -> HBM traffic.

    Zero VMEM footprint, so it compiles for arbitrarily large (B, S, H) on
    v5e / v6e / v7x without hitting scoped-VMEM limits."""
    if x.size == 0:
        return x

    orig_shape = x.shape
    if x.ndim >= 2:
        rows = math.prod(x.shape[:-1])
        cols = x.shape[-1]
    else:
        rows, cols = 1, (x.shape[0] if x.ndim == 1 else 1)

    itemsize = jnp.dtype(x.dtype).itemsize
    total_bytes = x.size * itemsize
    bounds = _chunk_plan(rows, cols, itemsize)
    n = len(bounds)

    x2 = x.reshape((rows, cols))  # free for contiguous arrays

    y2 = pl.pallas_call(
        _make_hbm_copy_kernel(bounds),
        out_shape=jax.ShapeDtypeStruct((rows, cols), x.dtype),
        # Raw HBM refs on both sides: the kernel moves data with explicit DMAs.
        in_specs=[pl.BlockSpec(memory_space=pl.ANY)],
        out_specs=pl.BlockSpec(memory_space=pl.ANY),
        scratch_shapes=[pltpu.SemaphoreType.DMA((n,))],
        cost_estimate=pl.CostEstimate(
            flops=0, transcendentals=0, bytes_accessed=2 * total_bytes
        ),
    )(x2)

    return y2.reshape(orig_shape)


def nollm_backbone_forward(
    inputs_embeds: jax.Array,
    *,
    materialize: bool = False,
    min_pallas_bytes: int = _SMALL_BYPASS_BYTES,
) -> ResultsObj:
    """Reproduces NoLLM_Backbone.forward: returns an object whose
    .last_hidden_state equals inputs_embeds bit-exactly.

    materialize=False (default) -> zero-cost pass-through (exactly what the
        PyTorch module does: it stores the same tensor object).
    materialize=True -> route through the Pallas HBM->HBM DMA copy kernel,
        unless the tensor is smaller than `min_pallas_bytes` (launch overhead
        would dominate), in which case it falls back to the pass-through."""
    results = ResultsObj()
    total_bytes = inputs_embeds.size * jnp.dtype(inputs_embeds.dtype).itemsize
    if (not materialize) or inputs_embeds.size == 0 or total_bytes < min_pallas_bytes:
        results.set_results(inputs_embeds)
        return results
    results.set_results(pallas_identity_copy(inputs_embeds))
    return results


if __name__ == "__main__":
    # NoLLM_Backbone has no parameters (its __init__ only builds Results_Obj),
    # so there are no weights to initialize.
    key = jax.random.PRNGKey(0)
    batch, seq, hidden = 2, 8, 32
    inputs_embeds = jax.random.normal(key, (batch, seq, hidden), dtype=jnp.float32)

    # 1) Exercise the Pallas DMA-copy kernel directly (forced onto the device).
    out_kernel = jax.block_until_ready(pallas_identity_copy(inputs_embeds))
    assert out_kernel.shape == inputs_embeds.shape
    assert out_kernel.dtype == inputs_embeds.dtype
    assert bool(jnp.all(out_kernel == inputs_embeds))

    # 2) Backbone forward, default (zero-traffic pass-through — the optimum).
    results_default = nollm_backbone_forward(inputs_embeds)
    out_default = jax.block_until_ready(results_default.last_hidden_state)
    assert bool(jnp.all(out_default == inputs_embeds))

    # 3) Backbone forward, materialized through the Pallas kernel (threshold
    #    lowered so the tiny smoke-test tensor still takes the kernel path).
    results_mat = nollm_backbone_forward(
        inputs_embeds, materialize=True, min_pallas_bytes=0
    )
    out_mat = jax.block_until_ready(results_mat.last_hidden_state)
    assert out_mat.shape == inputs_embeds.shape
    assert out_mat.dtype == inputs_embeds.dtype
    assert bool(jnp.all(out_mat == inputs_embeds))

    print("KERNEL_OK")
</pallas_src>

<mosaic_0001>
module attributes {stable_mosaic.version = 11 : i64} {
  func.func @kernel(%arg0: memref<16x32xf32, #tpu.memory_space<any>>, %arg1: memref<16x32xf32, #tpu.memory_space<any>>, %arg2: memref<1x!tpu.dma_semaphore, #tpu.memory_space<semaphore_mem>>) attributes {dimension_semantics = [], scalar_prefetch = 0 : i64, scratch_operands = 1 : i64, tpu.core_type = #tpu.core_type<tc>} {
    %c0_i32 = arith.constant 0 : i32
    %c0_i32_0 = arith.constant 0 : i32
    %c0_i32_1 = arith.constant 0 : i32
    %0 = tpu.memref_slice %arg0[%c0_i32_0, %c0_i32_1] : memref<16x32xf32, #tpu.memory_space<any>> -> memref<16x32xf32, #tpu.memory_space<any>>
    %c0_i32_2 = arith.constant 0 : i32
    %c0_i32_3 = arith.constant 0 : i32
    %1 = tpu.memref_slice %arg1[%c0_i32_2, %c0_i32_3] : memref<16x32xf32, #tpu.memory_space<any>> -> memref<16x32xf32, #tpu.memory_space<any>>
    %2 = tpu.memref_slice %arg2[%c0_i32] : memref<1x!tpu.dma_semaphore, #tpu.memory_space<semaphore_mem>> -> memref<1x!tpu.dma_semaphore, #tpu.memory_space<semaphore_mem>>
    %3 = tpu.memref_squeeze %2 : memref<1x!tpu.dma_semaphore, #tpu.memory_space<semaphore_mem>> -> memref<!tpu.dma_semaphore, #tpu.memory_space<semaphore_mem>>
    tpu.enqueue_dma source(%0 : memref<16x32xf32, #tpu.memory_space<any>>) target(%1 : memref<16x32xf32, #tpu.memory_space<any>>) target_semaphore(%3 : memref<!tpu.dma_semaphore, #tpu.memory_space<semaphore_mem>>)
    %c0_i32_4 = arith.constant 0 : i32
    %c0_i32_5 = arith.constant 0 : i32
    %c0_i32_6 = arith.constant 0 : i32
    %4 = tpu.memref_slice %arg0[%c0_i32_5, %c0_i32_6] : memref<16x32xf32, #tpu.memory_space<any>> -> memref<16x32xf32, #tpu.memory_space<any>>
    %c0_i32_7 = arith.constant 0 : i32
    %c0_i32_8 = arith.constant 0 : i32
    %5 = tpu.memref_slice %arg1[%c0_i32_7, %c0_i32_8] : memref<16x32xf32, #tpu.memory_space<any>> -> memref<16x32xf32, #tpu.memory_space<any>>
    %6 = tpu.memref_slice %arg2[%c0_i32_4] : memref<1x!tpu.dma_semaphore, #tpu.memory_space<semaphore_mem>> -> memref<1x!tpu.dma_semaphore, #tpu.memory_space<semaphore_mem>>
    %7 = tpu.memref_squeeze %6 : memref<1x!tpu.dma_semaphore, #tpu.memory_space<semaphore_mem>> -> memref<!tpu.dma_semaphore, #tpu.memory_space<semaphore_mem>>
    tpu.wait_dma2 semaphore(%7 : memref<!tpu.dma_semaphore, #tpu.memory_space<semaphore_mem>>) src(%4 : memref<16x32xf32, #tpu.memory_space<any>>) dst(%5 : memref<16x32xf32, #tpu.memory_space<any>>)
    return
  }
}

</mosaic_0001>

<bundles_post_ra>
// kernel: tpu_custom_call.1
= control target key start
LH: loop header
LB: loop body
LE: loop exit
PB: predicated region body
PF: predicated region fallthrough
CT: control target
= control target key end

     0   :  { %s34_s6 = smov [#allocation2]   ;;  %s35_s7 = smov [#allocation3]   ;;  %s53_s0 = inlined_call_operand.hbm [shape: f32[16,32], index: 0, kind: input, shape index: {}]   ;;  %s54_s1 = inlined_call_operand.hbm [shape: f32[16,32], index: 1, kind: output, shape index: {}]  }
   0x1   :  { %s36_s8 = smov 0  }
   0x2   :  { %18 = dma.general %s53_s0, 256, %s54_s1, %s34_s6, %s35_s7, [#allocation4], %s36_s8, 0  }
   0x3   :  { %32 = dma.done.wait [#allocation2], 256 }
   0x4   :  { %33 = vsyncadd [#allocation2], 4294967040 }
   0x5   :  { %22 = vsyncmov [#allocation2] }
   0x8   :  { %s23_s13 = vpop.sfrf %22 }
   0x9   :  { %p28_p0 = scmp.ne.s32.totalorder %s23_s13, 0 }
   0xb   :  { %27 = shalt.err (%p28_p0)  }

</bundles_post_ra>
